<compile_context>
chip_gen: v7x
topology: tpu7x:2x2x1
jax: 0.10.0
libtpu: 0.0.40
codegen_flags: <defaults>
</compile_context>

<pallas_src>
import functools

import jax
import jax.numpy as jnp
from jax.experimental import pallas as pl
from jax.experimental.pallas import tpu as pltpu


def _bilstm_tag_kernel(
    ids_ref,      # (L*B, 2)      int32  time-major rows [token@t=s, token@t=L-1-s]
    embproj_ref,  # (2V, 8H)      f32    [emb @ W_ih^T masked to fwd cols ; ... to bwd cols]
    whh_ref,      # (2H, 8H)      f32    block-diagonal W_hh^T, rows [h_fwd | h_bwd]
    b_ref,        # (1, 8H)       f32    fused bias b_ih + b_hh, cols [i_f i_b f_f f_b g_f g_b o_f o_b]
    perm_ref,     # (2*L*B, L*B)  f32    stacked row permutations (see epilogue)
    wout_ref,     # (2H, T)       f32    hidden2tag weight^T, rows [fwd H | bwd H]
    bout_ref,     # (1, T)        f32    hidden2tag bias
    out_ref,      # (B*L, T)      f32    emissions, batch-major rows (row = b*L + t)
    hs_ref,       # (L*B, 2H)     f32    scratch: step s rows hold [h_fwd@s | h_bwd@(L-1-s)]
    *,
    batch,        # static B
    seq_len,      # static L
):
    B, L = batch, seq_len
    LB = L * B
    H2 = whh_ref.shape[0]          # 2H
    H = H2 // 2
    G = whh_ref.shape[1]           # 8H fused gate width
    V = embproj_ref.shape[0] // 2

    # ---- embedding lookup + input projection (+ bias) + fwd/bwd time pairing
    #      for ALL steps in ONE MXU call against the pre-folded (2V, 8H) table.
    #      Row r = s*B + b is "two-hot": fwd token at col ids[r,0], bwd token
    #      at col V + ids[r,1]; the table is masked per direction, so the
    #      matmul is an exact per-direction row selection of emb @ W_ih^T. ----
    ids = ids_ref[...]                                              # (L*B, 2)
    col = jax.lax.broadcasted_iota(jnp.int32, (LB, 2 * V), 1)
    twohot = ((col == ids[:, 0:1]) | (col == ids[:, 1:2] + V)).astype(jnp.float32)
    xpair = (jnp.dot(twohot, embproj_ref[...],
                     preferred_element_type=jnp.float32)
             + b_ref[...])                                          # (L*B, 8H)

    whh = whh_ref[...]                                              # hoisted load

    h = jnp.zeros((B, H2), jnp.float32)    # [h_fwd | h_bwd]
    c = jnp.zeros((B, H2), jnp.float32)    # [c_fwd | c_bwd]

    # Interleaved fwd/bwd recurrence: step s advances fwd@t=s and bwd@t=L-1-s
    # together via a single (B, 2H) @ (2H, 8H) block-diagonal matmul, the only
    # truly serial work per step.
    for s in range(L):                     # L is small & static -> unrolled
        xp = xpair[s * B:(s + 1) * B, :]                            # (B, 8H) already paired
        gates = xp + jnp.dot(h, whh, preferred_element_type=jnp.float32)
        sg = jax.nn.sigmoid(gates)                                  # full width (i, f, o all used)
        th = jnp.tanh(gates[:, 2 * H2:])                            # only the lane-aligned vreg with g
        i_g = sg[:, 0 * H2:1 * H2]         # [i_f | i_b]
        f_g = sg[:, 1 * H2:2 * H2]         # [f_f | f_b]
        g_g = th[:, :H2]                   # [g_f | g_b]
        o_g = sg[:, 3 * H2:4 * H2]         # [o_f | o_b]
        c = f_g * c + i_g * g_g
        h = o_g * jnp.tanh(c)
        hs_ref[s * B:(s + 1) * B, :] = h   # ONE store per step (opt 6)

    # ---- epilogue, off the serial path: re-pair fwd/bwd time indices and go
    #      from time-major to batch-major rows with one tiny stacked
    #      permutation matmul, then a single output projection (opt 4). ----
    hs_flat = hs_ref[...]                                           # (L*B, 2H) time-major
    both = jnp.dot(perm_ref[...], hs_flat,
                   preferred_element_type=jnp.float32)              # (2*L*B, 2H)
    half = jax.lax.broadcasted_iota(jnp.int32, (1, H2), 1) < H
    # rows of both[:LB]: batch-major fwd source (t*B+b); rows of both[LB:]:
    # batch-major, time-reversed bwd source ((L-1-t)*B+b)  ->  paired row
    # b*L+t = [h_fwd@t | h_bwd@t].
    paired = jnp.where(half, both[:LB], both[LB:])                  # (L*B, 2H) batch-major
    em = (jnp.dot(paired, wout_ref[...], preferred_element_type=jnp.float32)
          + bout_ref[...])                                          # (B*L, T)
    # TODO(synk): num_tags=8 < 128 lanes -> masked partial stores; only worth a
    # lane-dense restructuring if num_tags / B*L are scaled up.
    out_ref[...] = em.astype(out_ref.dtype)


def _fuse_gate_columns(w_f, w_b):
    """Interleave per-gate column blocks -> [i_f i_b f_f f_b g_f g_b o_f o_b]."""
    H = w_f.shape[-1] // 4
    parts = []
    for g in range(4):
        parts.append(w_f[..., g * H:(g + 1) * H])
        parts.append(w_b[..., g * H:(g + 1) * H])
    return jnp.concatenate(parts, axis=-1)


def init_params(key, vocab_size, embed_dim, lstm_units, num_tags, padding_idx=0):
    """Deterministic synthetic parameters (shapes match nn.Embedding/nn.LSTM/nn.Linear)."""
    ks = jax.random.split(key, 12)
    H, E, T = lstm_units, embed_dim, num_tags
    scale = 0.1

    embedding = jax.random.normal(ks[0], (vocab_size, E), jnp.float32) * scale
    embedding = embedding.at[padding_idx].set(0.0)  # padding_idx row is zero

    def u(k, shape):
        return jax.random.uniform(k, shape, jnp.float32, -scale, scale)

    params = {
        "embedding": embedding,
        # forward direction (PyTorch gate order i, f, g, o along the 4H axis)
        "wih_f_T": u(ks[1], (E, 4 * H)),      # W_ih (4H, E) transposed
        "whh_f_T": u(ks[2], (H, 4 * H)),      # W_hh (4H, H) transposed
        "b_f": (u(ks[3], (1, 4 * H)) + u(ks[4], (1, 4 * H))),  # b_ih + b_hh
        # backward direction
        "wih_b_T": u(ks[5], (E, 4 * H)),
        "whh_b_T": u(ks[6], (H, 4 * H)),
        "b_b": (u(ks[7], (1, 4 * H)) + u(ks[8], (1, 4 * H))),
        # hidden2tag: Linear(2H -> T)
        "wout_T": u(ks[9], (2 * H, T)),       # weight (T, 2H) transposed
        "bout": u(ks[10], (1, T)),
    }
    return params


@functools.partial(jax.jit, static_argnames=("num_tags",))
def bilstm_crf_forward(word_ids, params, num_tags):
    """word_ids: (B, L) int32 -> emissions (B, L, num_tags) float32."""
    B, L = word_ids.shape
    H = params["whh_f_T"].shape[0]
    G = 8 * H
    hp = jax.lax.Precision.HIGHEST

    # Fused weight layouts (tiny one-time XLA prep per call):
    wih_cat = _fuse_gate_columns(params["wih_f_T"], params["wih_b_T"])       # (E, 8H)
    zeros_h = jnp.zeros_like(params["whh_f_T"])
    whh_bd = jnp.concatenate(
        [_fuse_gate_columns(params["whh_f_T"], zeros_h),
         _fuse_gate_columns(zeros_h, params["whh_b_T"])], axis=0)            # (2H, 8H)
    b_cat = _fuse_gate_columns(params["b_f"], params["b_b"])                 # (1, 8H)

    # Opt (1)+(3): fold the embedding into the input projection and mask per
    # direction so a single two-hot matmul in the kernel also performs the
    # fwd/bwd time pairing.  emb_proj2 is (2V, 8H) ~ 64 KB.
    emb_proj = jnp.dot(params["embedding"].astype(jnp.float32), wih_cat,
                       precision=hp)                                         # (V, 8H)
    fwd_cols = ((jnp.arange(G) // H) % 2 == 0)[None, :]
    emb_proj2 = jnp.concatenate(
        [jnp.where(fwd_cols, emb_proj, 0.0),
         jnp.where(fwd_cols, 0.0, emb_proj)], axis=0)                        # (2V, 8H)

    # Time-major (row = s*B + b) paired token ids: [token@t=s, token@t=L-1-s].
    # NOTE: ids are assumed in [0, vocab); an out-of-range id yields an
    # all-zero embedding row instead of raising like nn.Embedding would.
    ids = word_ids.astype(jnp.int32)
    ids_tm = ids.T                                                           # (L, B)
    ids_pair = jnp.stack([ids_tm, ids_tm[::-1, :]], axis=-1).reshape(L * B, 2)

    # Stacked row permutations for the epilogue: first L*B rows map batch-major
    # (b,t) <- time-major t*B+b (fwd half), next L*B rows additionally reverse
    # time, (b,t) <- (L-1-t)*B+b (bwd half).
    row = jnp.arange(L * B)
    b_idx, t_idx = row // L, row % L
    perm = jnp.concatenate(
        [jax.nn.one_hot(t_idx * B + b_idx, L * B, dtype=jnp.float32),
         jax.nn.one_hot((L - 1 - t_idx) * B + b_idx, L * B, dtype=jnp.float32)],
        axis=0)                                                              # (2*L*B, L*B)

    kernel = functools.partial(_bilstm_tag_kernel, batch=B, seq_len=L)
    vmem = pl.BlockSpec(memory_space=pltpu.MemorySpace.VMEM)
    out = pl.pallas_call(
        kernel,
        out_shape=jax.ShapeDtypeStruct((B * L, num_tags), jnp.float32),
        in_specs=[vmem] * 7,
        out_specs=vmem,
        scratch_shapes=[
            pltpu.VMEM((L * B, 2 * H), jnp.float32),   # per-step hidden states
        ],
    )(
        ids_pair, emb_proj2, whh_bd, b_cat, perm,
        params["wout_T"], params["bout"],
    )
    # Row-major (B*L, T) == (B, L, T) flattened -> free metadata reshape.
    return out.reshape(B, L, num_tags)


def _reference_forward(word_ids, params, num_tags):
    """Pure-JAX reference (same math as PyTorch forward()) for correctness."""
    hp = jax.lax.Precision.HIGHEST
    embed = params["embedding"][word_ids].astype(jnp.float32)
    B, L, E = embed.shape
    H = params["whh_f_T"].shape[0]

    def run(wih_T, whh_T, b, xs):
        def step(carry, xt):
            h, c = carry
            gates = (jnp.dot(xt, wih_T, precision=hp)
                     + jnp.dot(h, whh_T, precision=hp) + b[0])
            i_g = jax.nn.sigmoid(gates[:, 0 * H:1 * H])
            f_g = jax.nn.sigmoid(gates[:, 1 * H:2 * H])
            g_g = jnp.tanh(gates[:, 2 * H:3 * H])
            o_g = jax.nn.sigmoid(gates[:, 3 * H:4 * H])
            c = f_g * c + i_g * g_g
            h = o_g * jnp.tanh(c)
            return (h, c), h
        init = (jnp.zeros((B, H)), jnp.zeros((B, H)))
        _, hs = jax.lax.scan(step, init, jnp.swapaxes(xs, 0, 1))
        return jnp.swapaxes(hs, 0, 1)  # (B, L, H)

    hf = run(params["wih_f_T"], params["whh_f_T"], params["b_f"], embed)
    hb = run(params["wih_b_T"], params["whh_b_T"], params["b_b"],
             embed[:, ::-1, :])[:, ::-1, :]
    lstm_out = jnp.concatenate([hf, hb], axis=-1)
    return jnp.dot(lstm_out, params["wout_T"], precision=hp) + params["bout"][0]


if __name__ == "__main__":
    # Small shapes consistent with the module.  (Rows are padded to 8 sublanes
    # in every vreg/matmul anyway, so batching up to 8 sequences per call is
    # essentially free -- opt 8; the demo keeps the module's B=2.)
    VOCAB, EMBED, HIDDEN, NUM_TAGS = 32, 16, 32, 8
    BATCH, SEQ = 2, 8

    key = jax.random.PRNGKey(0)
    k_param, k_ids = jax.random.split(key)
    params = init_params(k_param, VOCAB, EMBED, HIDDEN, NUM_TAGS)
    word_ids = jax.random.randint(k_ids, (BATCH, SEQ), 0, VOCAB, dtype=jnp.int32)

    emissions = bilstm_crf_forward(word_ids, params, num_tags=NUM_TAGS)
    emissions = jax.block_until_ready(emissions)

    ref = _reference_forward(word_ids, params, NUM_TAGS)
    assert emissions.shape == (BATCH, SEQ, NUM_TAGS), emissions.shape
    max_err = float(jnp.max(jnp.abs(emissions - ref)))
    # Tolerance leaves headroom for TPU matmul pass-precision differences
    # between XLA and Mosaic; real logic bugs produce errors >> 1e-2.
    assert jnp.allclose(emissions, ref, atol=5e-3, rtol=5e-3), (
        f"mismatch vs reference, max_abs_err={max_err}")

    # TODO(synk): CRF compute_loss / Viterbi decode are not part of forward();
    # only the emission path is implemented here.
    print("KERNEL_OK")
</pallas_src>

<mosaic_0001>
module attributes {stable_mosaic.version = 11 : i64} {
  func.func @_bilstm_tag_kernel(%arg0: memref<16x2xi32, #tpu.memory_space<vmem>>, %arg1: memref<64x256xf32, #tpu.memory_space<vmem>>, %arg2: memref<64x256xf32, #tpu.memory_space<vmem>>, %arg3: memref<1x256xf32, #tpu.memory_space<vmem>>, %arg4: memref<32x16xf32, #tpu.memory_space<vmem>>, %arg5: memref<64x8xf32, #tpu.memory_space<vmem>>, %arg6: memref<1x8xf32, #tpu.memory_space<vmem>>, %arg7: memref<16x8xf32, #tpu.memory_space<vmem>>, %arg8: memref<16x64xf32, #tpu.memory_space<vmem>>) attributes {dimension_semantics = [], scalar_prefetch = 0 : i64, scratch_operands = 1 : i64, tpu.core_type = #tpu.core_type<tc>} {
    %c0 = arith.constant 0 : index
    %c0_0 = arith.constant 0 : index
    %0 = vector.load %arg0[%c0, %c0_0] : memref<16x2xi32, #tpu.memory_space<vmem>>, vector<16x2xi32>
    %1 = tpu.iota {dimensions = array<i32: 1>} : vector<16x64xi32>
    %2 = vector.extract_strided_slice %0 {offsets = [0, 0], sizes = [16, 1], strides = [1, 1]} : vector<16x2xi32> to vector<16x1xi32>
    %3 = vector.broadcast %2 : vector<16x1xi32> to vector<16x64xi32>
    %4 = arith.cmpi eq, %1, %3 : vector<16x64xi32>
    %5 = vector.extract_strided_slice %0 {offsets = [0, 1], sizes = [16, 1], strides = [1, 1]} : vector<16x2xi32> to vector<16x1xi32>
    %c32_i32 = arith.constant 32 : i32
    %6 = vector.broadcast %c32_i32 : i32 to vector<16x1xi32>
    %7 = arith.addi %5, %6 : vector<16x1xi32>
    %8 = vector.broadcast %7 : vector<16x1xi32> to vector<16x64xi32>
    %9 = arith.cmpi eq, %1, %8 : vector<16x64xi32>
    %10 = arith.ori %4, %9 : vector<16x64xi1>
    %11 = arith.extui %10 : vector<16x64xi1> to vector<16x64xi32>
    %12 = arith.sitofp %11 : vector<16x64xi32> to vector<16x64xf32>
    %c0_1 = arith.constant 0 : index
    %c0_2 = arith.constant 0 : index
    %13 = vector.load %arg1[%c0_1, %c0_2] : memref<64x256xf32, #tpu.memory_space<vmem>>, vector<64x256xf32>
    %cst = arith.constant dense<0.000000e+00> : vector<16x256xf32>
    %14 = tpu.matmul %12, %13, %cst {dimension_numbers = #tpu.dot_dimension_numbers<[1], [0], [0], [1], [0, 0, 1, 1], [], []>} : vector<16x64xf32>, vector<64x256xf32>, vector<16x256xf32> -> vector<16x256xf32>
    %c0_3 = arith.constant 0 : index
    %c0_4 = arith.constant 0 : index
    %15 = vector.load %arg3[%c0_3, %c0_4] : memref<1x256xf32, #tpu.memory_space<vmem>>, vector<1x256xf32>
    %16 = vector.broadcast %15 : vector<1x256xf32> to vector<16x256xf32>
    %17 = arith.addf %14, %16 : vector<16x256xf32>
    %c0_5 = arith.constant 0 : index
    %c0_6 = arith.constant 0 : index
    %18 = vector.load %arg2[%c0_5, %c0_6] : memref<64x256xf32, #tpu.memory_space<vmem>>, vector<64x256xf32>
    %cst_7 = arith.constant 0.000000e+00 : f32
    %19 = vector.broadcast %cst_7 : f32 to vector<2x64xf32>
    %cst_8 = arith.constant 0.000000e+00 : f32
    %20 = vector.broadcast %cst_8 : f32 to vector<2x64xf32>
    %21 = vector.extract_strided_slice %17 {offsets = [0, 0], sizes = [2, 256], strides = [1, 1]} : vector<16x256xf32> to vector<2x256xf32>
    %cst_9 = arith.constant dense<0.000000e+00> : vector<2x256xf32>
    %22 = tpu.matmul %19, %18, %cst_9 {dimension_numbers = #tpu.dot_dimension_numbers<[1], [0], [0], [1], [0, 0, 1, 1], [], []>} : vector<2x64xf32>, vector<64x256xf32>, vector<2x256xf32> -> vector<2x256xf32>
    %23 = arith.addf %21, %22 : vector<2x256xf32>
    %24 = arith.negf %23 : vector<2x256xf32>
    %25 = math.exp %24 : vector<2x256xf32>
    %cst_10 = arith.constant 1.000000e+00 : f32
    %26 = vector.broadcast %cst_10 : f32 to vector<2x256xf32>
    %27 = arith.addf %26, %25 : vector<2x256xf32>
    %28 = arith.divf %26, %27 : vector<2x256xf32>
    %29 = vector.extract_strided_slice %23 {offsets = [0, 128], sizes = [2, 128], strides = [1, 1]} : vector<2x256xf32> to vector<2x128xf32>
    %30 = math.tanh %29 : vector<2x128xf32>
    %31 = vector.extract_strided_slice %28 {offsets = [0, 0], sizes = [2, 64], strides = [1, 1]} : vector<2x256xf32> to vector<2x64xf32>
    %32 = vector.extract_strided_slice %28 {offsets = [0, 64], sizes = [2, 64], strides = [1, 1]} : vector<2x256xf32> to vector<2x64xf32>
    %33 = vector.extract_strided_slice %30 {offsets = [0, 0], sizes = [2, 64], strides = [1, 1]} : vector<2x128xf32> to vector<2x64xf32>
    %34 = vector.extract_strided_slice %28 {offsets = [0, 192], sizes = [2, 64], strides = [1, 1]} : vector<2x256xf32> to vector<2x64xf32>
    %35 = arith.mulf %32, %20 : vector<2x64xf32>
    %36 = arith.mulf %31, %33 : vector<2x64xf32>
    %37 = arith.addf %35, %36 : vector<2x64xf32>
    %38 = math.tanh %37 : vector<2x64xf32>
    %39 = arith.mulf %34, %38 : vector<2x64xf32>
    %c0_11 = arith.constant 0 : index
    %c0_12 = arith.constant 0 : index
    %40 = vector.load %arg8[%c0_11, %c0_12] : memref<16x64xf32, #tpu.memory_space<vmem>>, vector<2x64xf32>
    tpu.vector_store %arg8[%c0_11, %c0_12], %39 {strides = array<i32>} : memref<16x64xf32, #tpu.memory_space<vmem>>, vector<2x64xf32>,
    %41 = vector.extract_strided_slice %17 {offsets = [2, 0], sizes = [2, 256], strides = [1, 1]} : vector<16x256xf32> to vector<2x256xf32>
    %cst_13 = arith.constant dense<0.000000e+00> : vector<2x256xf32>
    %42 = tpu.matmul %39, %18, %cst_13 {dimension_numbers = #tpu.dot_dimension_numbers<[1], [0], [0], [1], [0, 0, 1, 1], [], []>} : vector<2x64xf32>, vector<64x256xf32>, vector<2x256xf32> -> vector<2x256xf32>
    %43 = arith.addf %41, %42 : vector<2x256xf32>
    %44 = arith.negf %43 : vector<2x256xf32>
    %45 = math.exp %44 : vector<2x256xf32>
    %cst_14 = arith.constant 1.000000e+00 : f32
    %46 = vector.broadcast %cst_14 : f32 to vector<2x256xf32>
    %47 = arith.addf %46, %45 : vector<2x256xf32>
    %48 = arith.divf %46, %47 : vector<2x256xf32>
    %49 = vector.extract_strided_slice %43 {offsets = [0, 128], sizes = [2, 128], strides = [1, 1]} : vector<2x256xf32> to vector<2x128xf32>
    %50 = math.tanh %49 : vector<2x128xf32>
    %51 = vector.extract_strided_slice %48 {offsets = [0, 0], sizes = [2, 64], strides = [1, 1]} : vector<2x256xf32> to vector<2x64xf32>
    %52 = vector.extract_strided_slice %48 {offsets = [0, 64], sizes = [2, 64], strides = [1, 1]} : vector<2x256xf32> to vector<2x64xf32>
    %53 = vector.extract_strided_slice %50 {offsets = [0, 0], sizes = [2, 64], strides = [1, 1]} : vector<2x128xf32> to vector<2x64xf32>
    %54 = vector.extract_strided_slice %48 {offsets = [0, 192], sizes = [2, 64], strides = [1, 1]} : vector<2x256xf32> to vector<2x64xf32>
    %55 = arith.mulf %52, %37 : vector<2x64xf32>
    %56 = arith.mulf %51, %53 : vector<2x64xf32>
    %57 = arith.addf %55, %56 : vector<2x64xf32>
    %58 = math.tanh %57 : vector<2x64xf32>
    %59 = arith.mulf %54, %58 : vector<2x64xf32>
    %c2 = arith.constant 2 : index
    %c0_15 = arith.constant 0 : index
    %60 = vector.load %arg8[%c2, %c0_15] : memref<16x64xf32, #tpu.memory_space<vmem>>, vector<2x64xf32>
    tpu.vector_store %arg8[%c2, %c0_15], %59 {strides = array<i32>} : memref<16x64xf32, #tpu.memory_space<vmem>>, vector<2x64xf32>,
    %61 = vector.extract_strided_slice %17 {offsets = [4, 0], sizes = [2, 256], strides = [1, 1]} : vector<16x256xf32> to vector<2x256xf32>
    %cst_16 = arith.constant dense<0.000000e+00> : vector<2x256xf32>
    %62 = tpu.matmul %59, %18, %cst_16 {dimension_numbers = #tpu.dot_dimension_numbers<[1], [0], [0], [1], [0, 0, 1, 1], [], []>} : vector<2x64xf32>, vector<64x256xf32>, vector<2x256xf32> -> vector<2x256xf32>
    %63 = arith.addf %61, %62 : vector<2x256xf32>
    %64 = arith.negf %63 : vector<2x256xf32>
    %65 = math.exp %64 : vector<2x256xf32>
    %cst_17 = arith.constant 1.000000e+00 : f32
    %66 = vector.broadcast %cst_17 : f32 to vector<2x256xf32>
    %67 = arith.addf %66, %65 : vector<2x256xf32>
    %68 = arith.divf %66, %67 : vector<2x256xf32>
    %69 = vector.extract_strided_slice %63 {offsets = [0, 128], sizes = [2, 128], strides = [1, 1]} : vector<2x256xf32> to vector<2x128xf32>
    %70 = math.tanh %69 : vector<2x128xf32>
    %71 = vector.extract_strided_slice %68 {offsets = [0, 0], sizes = [2, 64], strides = [1, 1]} : vector<2x256xf32> to vector<2x64xf32>
    %72 = vector.extract_strided_slice %68 {offsets = [0, 64], sizes = [2, 64], strides = [1, 1]} : vector<2x256xf32> to vector<2x64xf32>
    %73 = vector.extract_strided_slice %70 {offsets = [0, 0], sizes = [2, 64], strides = [1, 1]} : vector<2x128xf32> to vector<2x64xf32>
    %74 = vector.extract_strided_slice %68 {offsets = [0, 192], sizes = [2, 64], strides = [1, 1]} : vector<2x256xf32> to vector<2x64xf32>
    %75 = arith.mulf %72, %57 : vector<2x64xf32>
    %76 = arith.mulf %71, %73 : vector<2x64xf32>
    %77 = arith.addf %75, %76 : vector<2x64xf32>
    %78 = math.tanh %77 : vector<2x64xf32>
    %79 = arith.mulf %74, %78 : vector<2x64xf32>
    %c4 = arith.constant 4 : index
    %c0_18 = arith.constant 0 : index
    %80 = vector.load %arg8[%c4, %c0_18] : memref<16x64xf32, #tpu.memory_space<vmem>>, vector<2x64xf32>
    tpu.vector_store %arg8[%c4, %c0_18], %79 {strides = array<i32>} : memref<16x64xf32, #tpu.memory_space<vmem>>, vector<2x64xf32>,
    %81 = vector.extract_strided_slice %17 {offsets = [6, 0], sizes = [2, 256], strides = [1, 1]} : vector<16x256xf32> to vector<2x256xf32>
    %cst_19 = arith.constant dense<0.000000e+00> : vector<2x256xf32>
    %82 = tpu.matmul %79, %18, %cst_19 {dimension_numbers = #tpu.dot_dimension_numbers<[1], [0], [0], [1], [0, 0, 1, 1], [], []>} : vector<2x64xf32>, vector<64x256xf32>, vector<2x256xf32> -> vector<2x256xf32>
    %83 = arith.addf %81, %82 : vector<2x256xf32>
    %84 = arith.negf %83 : vector<2x256xf32>
    %85 = math.exp %84 : vector<2x256xf32>
    %cst_20 = arith.constant 1.000000e+00 : f32
    %86 = vector.broadcast %cst_20 : f32 to vector<2x256xf32>
    %87 = arith.addf %86, %85 : vector<2x256xf32>
    %88 = arith.divf %86, %87 : vector<2x256xf32>
    %89 = vector.extract_strided_slice %83 {offsets = [0, 128], sizes = [2, 128], strides = [1, 1]} : vector<2x256xf32> to vector<2x128xf32>
    %90 = math.tanh %89 : vector<2x128xf32>
    %91 = vector.extract_strided_slice %88 {offsets = [0, 0], sizes = [2, 64], strides = [1, 1]} : vector<2x256xf32> to vector<2x64xf32>
    %92 = vector.extract_strided_slice %88 {offsets = [0, 64], sizes = [2, 64], strides = [1, 1]} : vector<2x256xf32> to vector<2x64xf32>
    %93 = vector.extract_strided_slice %90 {offsets = [0, 0], sizes = [2, 64], strides = [1, 1]} : vector<2x128xf32> to vector<2x64xf32>
    %94 = vector.extract_strided_slice %88 {offsets = [0, 192], sizes = [2, 64], strides = [1, 1]} : vector<2x256xf32> to vector<2x64xf32>
    %95 = arith.mulf %92, %77 : vector<2x64xf32>
    %96 = arith.mulf %91, %93 : vector<2x64xf32>
    %97 = arith.addf %95, %96 : vector<2x64xf32>
    %98 = math.tanh %97 : vector<2x64xf32>
    %99 = arith.mulf %94, %98 : vector<2x64xf32>
    %c6 = arith.constant 6 : index
    %c0_21 = arith.constant 0 : index
    %100 = vector.load %arg8[%c6, %c0_21] : memref<16x64xf32, #tpu.memory_space<vmem>>, vector<2x64xf32>
    tpu.vector_store %arg8[%c6, %c0_21], %99 {strides = array<i32>} : memref<16x64xf32, #tpu.memory_space<vmem>>, vector<2x64xf32>,
    %101 = vector.extract_strided_slice %17 {offsets = [8, 0], sizes = [2, 256], strides = [1, 1]} : vector<16x256xf32> to vector<2x256xf32>
    %cst_22 = arith.constant dense<0.000000e+00> : vector<2x256xf32>
    %102 = tpu.matmul %99, %18, %cst_22 {dimension_numbers = #tpu.dot_dimension_numbers<[1], [0], [0], [1], [0, 0, 1, 1], [], []>} : vector<2x64xf32>, vector<64x256xf32>, vector<2x256xf32> -> vector<2x256xf32>
    %103 = arith.addf %101, %102 : vector<2x256xf32>
    %104 = arith.negf %103 : vector<2x256xf32>
    %105 = math.exp %104 : vector<2x256xf32>
    %cst_23 = arith.constant 1.000000e+00 : f32
    %106 = vector.broadcast %cst_23 : f32 to vector<2x256xf32>
    %107 = arith.addf %106, %105 : vector<2x256xf32>
    %108 = arith.divf %106, %107 : vector<2x256xf32>
    %109 = vector.extract_strided_slice %103 {offsets = [0, 128], sizes = [2, 128], strides = [1, 1]} : vector<2x256xf32> to vector<2x128xf32>
    %110 = math.tanh %109 : vector<2x128xf32>
    %111 = vector.extract_strided_slice %108 {offsets = [0, 0], sizes = [2, 64], strides = [1, 1]} : vector<2x256xf32> to vector<2x64xf32>
    %112 = vector.extract_strided_slice %108 {offsets = [0, 64], sizes = [2, 64], strides = [1, 1]} : vector<2x256xf32> to vector<2x64xf32>
    %113 = vector.extract_strided_slice %110 {offsets = [0, 0], sizes = [2, 64], strides = [1, 1]} : vector<2x128xf32> to vector<2x64xf32>
    %114 = vector.extract_strided_slice %108 {offsets = [0, 192], sizes = [2, 64], strides = [1, 1]} : vector<2x256xf32> to vector<2x64xf32>
    %115 = arith.mulf %112, %97 : vector<2x64xf32>
    %116 = arith.mulf %111, %113 : vector<2x64xf32>
    %117 = arith.addf %115, %116 : vector<2x64xf32>
    %118 = math.tanh %117 : vector<2x64xf32>
    %119 = arith.mulf %114, %118 : vector<2x64xf32>
    %c8 = arith.constant 8 : index
    %c0_24 = arith.constant 0 : index
    %120 = vector.load %arg8[%c8, %c0_24] : memref<16x64xf32, #tpu.memory_space<vmem>>, vector<2x64xf32>
    tpu.vector_store %arg8[%c8, %c0_24], %119 {strides = array<i32>} : memref<16x64xf32, #tpu.memory_space<vmem>>, vector<2x64xf32>,
    %121 = vector.extract_strided_slice %17 {offsets = [10, 0], sizes = [2, 256], strides = [1, 1]} : vector<16x256xf32> to vector<2x256xf32>
    %cst_25 = arith.constant dense<0.000000e+00> : vector<2x256xf32>
    %122 = tpu.matmul %119, %18, %cst_25 {dimension_numbers = #tpu.dot_dimension_numbers<[1], [0], [0], [1], [0, 0, 1, 1], [], []>} : vector<2x64xf32>, vector<64x256xf32>, vector<2x256xf32> -> vector<2x256xf32>
    %123 = arith.addf %121, %122 : vector<2x256xf32>
    %124 = arith.negf %123 : vector<2x256xf32>
    %125 = math.exp %124 : vector<2x256xf32>
    %cst_26 = arith.constant 1.000000e+00 : f32
    %126 = vector.broadcast %cst_26 : f32 to vector<2x256xf32>
    %127 = arith.addf %126, %125 : vector<2x256xf32>
    %128 = arith.divf %126, %127 : vector<2x256xf32>
    %129 = vector.extract_strided_slice %123 {offsets = [0, 128], sizes = [2, 128], strides = [1, 1]} : vector<2x256xf32> to vector<2x128xf32>
    %130 = math.tanh %129 : vector<2x128xf32>
    %131 = vector.extract_strided_slice %128 {offsets = [0, 0], sizes = [2, 64], strides = [1, 1]} : vector<2x256xf32> to vector<2x64xf32>
    %132 = vector.extract_strided_slice %128 {offsets = [0, 64], sizes = [2, 64], strides = [1, 1]} : vector<2x256xf32> to vector<2x64xf32>
    %133 = vector.extract_strided_slice %130 {offsets = [0, 0], sizes = [2, 64], strides = [1, 1]} : vector<2x128xf32> to vector<2x64xf32>
    %134 = vector.extract_strided_slice %128 {offsets = [0, 192], sizes = [2, 64], strides = [1, 1]} : vector<2x256xf32> to vector<2x64xf32>
    %135 = arith.mulf %132, %117 : vector<2x64xf32>
    %136 = arith.mulf %131, %133 : vector<2x64xf32>
    %137 = arith.addf %135, %136 : vector<2x64xf32>
    %138 = math.tanh %137 : vector<2x64xf32>
    %139 = arith.mulf %134, %138 : vector<2x64xf32>
    %c10 = arith.constant 10 : index
    %c0_27 = arith.constant 0 : index
    %140 = vector.load %arg8[%c10, %c0_27] : memref<16x64xf32, #tpu.memory_space<vmem>>, vector<2x64xf32>
    tpu.vector_store %arg8[%c10, %c0_27], %139 {strides = array<i32>} : memref<16x64xf32, #tpu.memory_space<vmem>>, vector<2x64xf32>,
    %141 = vector.extract_strided_slice %17 {offsets = [12, 0], sizes = [2, 256], strides = [1, 1]} : vector<16x256xf32> to vector<2x256xf32>
    %cst_28 = arith.constant dense<0.000000e+00> : vector<2x256xf32>
    %142 = tpu.matmul %139, %18, %cst_28 {dimension_numbers = #tpu.dot_dimension_numbers<[1], [0], [0], [1], [0, 0, 1, 1], [], []>} : vector<2x64xf32>, vector<64x256xf32>, vector<2x256xf32> -> vector<2x256xf32>
    %143 = arith.addf %141, %142 : vector<2x256xf32>
    %144 = arith.negf %143 : vector<2x256xf32>
    %145 = math.exp %144 : vector<2x256xf32>
    %cst_29 = arith.constant 1.000000e+00 : f32
    %146 = vector.broadcast %cst_29 : f32 to vector<2x256xf32>
    %147 = arith.addf %146, %145 : vector<2x256xf32>
    %148 = arith.divf %146, %147 : vector<2x256xf32>
    %149 = vector.extract_strided_slice %143 {offsets = [0, 128], sizes = [2, 128], strides = [1, 1]} : vector<2x256xf32> to vector<2x128xf32>
    %150 = math.tanh %149 : vector<2x128xf32>
    %151 = vector.extract_strided_slice %148 {offsets = [0, 0], sizes = [2, 64], strides = [1, 1]} : vector<2x256xf32> to vector<2x64xf32>
    %152 = vector.extract_strided_slice %148 {offsets = [0, 64], sizes = [2, 64], strides = [1, 1]} : vector<2x256xf32> to vector<2x64xf32>
    %153 = vector.extract_strided_slice %150 {offsets = [0, 0], sizes = [2, 64], strides = [1, 1]} : vector<2x128xf32> to vector<2x64xf32>
    %154 = vector.extract_strided_slice %148 {offsets = [0, 192], sizes = [2, 64], strides = [1, 1]} : vector<2x256xf32> to vector<2x64xf32>
    %155 = arith.mulf %152, %137 : vector<2x64xf32>
    %156 = arith.mulf %151, %153 : vector<2x64xf32>
    %157 = arith.addf %155, %156 : vector<2x64xf32>
    %158 = math.tanh %157 : vector<2x64xf32>
    %159 = arith.mulf %154, %158 : vector<2x64xf32>
    %c12 = arith.constant 12 : index
    %c0_30 = arith.constant 0 : index
    %160 = vector.load %arg8[%c12, %c0_30] : memref<16x64xf32, #tpu.memory_space<vmem>>, vector<2x64xf32>
    tpu.vector_store %arg8[%c12, %c0_30], %159 {strides = array<i32>} : memref<16x64xf32, #tpu.memory_space<vmem>>, vector<2x64xf32>,
    %161 = vector.extract_strided_slice %17 {offsets = [14, 0], sizes = [2, 256], strides = [1, 1]} : vector<16x256xf32> to vector<2x256xf32>
    %cst_31 = arith.constant dense<0.000000e+00> : vector<2x256xf32>
    %162 = tpu.matmul %159, %18, %cst_31 {dimension_numbers = #tpu.dot_dimension_numbers<[1], [0], [0], [1], [0, 0, 1, 1], [], []>} : vector<2x64xf32>, vector<64x256xf32>, vector<2x256xf32> -> vector<2x256xf32>
    %163 = arith.addf %161, %162 : vector<2x256xf32>
    %164 = arith.negf %163 : vector<2x256xf32>
    %165 = math.exp %164 : vector<2x256xf32>
    %cst_32 = arith.constant 1.000000e+00 : f32
    %166 = vector.broadcast %cst_32 : f32 to vector<2x256xf32>
    %167 = arith.addf %166, %165 : vector<2x256xf32>
    %168 = arith.divf %166, %167 : vector<2x256xf32>
    %169 = vector.extract_strided_slice %163 {offsets = [0, 128], sizes = [2, 128], strides = [1, 1]} : vector<2x256xf32> to vector<2x128xf32>
    %170 = math.tanh %169 : vector<2x128xf32>
    %171 = vector.extract_strided_slice %168 {offsets = [0, 0], sizes = [2, 64], strides = [1, 1]} : vector<2x256xf32> to vector<2x64xf32>
    %172 = vector.extract_strided_slice %168 {offsets = [0, 64], sizes = [2, 64], strides = [1, 1]} : vector<2x256xf32> to vector<2x64xf32>
    %173 = vector.extract_strided_slice %170 {offsets = [0, 0], sizes = [2, 64], strides = [1, 1]} : vector<2x128xf32> to vector<2x64xf32>
    %174 = vector.extract_strided_slice %168 {offsets = [0, 192], sizes = [2, 64], strides = [1, 1]} : vector<2x256xf32> to vector<2x64xf32>
    %175 = arith.mulf %172, %157 : vector<2x64xf32>
    %176 = arith.mulf %171, %173 : vector<2x64xf32>
    %177 = arith.addf %175, %176 : vector<2x64xf32>
    %178 = math.tanh %177 : vector<2x64xf32>
    %179 = arith.mulf %174, %178 : vector<2x64xf32>
    %c14 = arith.constant 14 : index
    %c0_33 = arith.constant 0 : index
    %180 = vector.load %arg8[%c14, %c0_33] : memref<16x64xf32, #tpu.memory_space<vmem>>, vector<2x64xf32>
    tpu.vector_store %arg8[%c14, %c0_33], %179 {strides = array<i32>} : memref<16x64xf32, #tpu.memory_space<vmem>>, vector<2x64xf32>,
    %c0_34 = arith.constant 0 : index
    %c0_35 = arith.constant 0 : index
    %181 = vector.load %arg8[%c0_34, %c0_35] : memref<16x64xf32, #tpu.memory_space<vmem>>, vector<16x64xf32>
    %c0_36 = arith.constant 0 : index
    %c0_37 = arith.constant 0 : index
    %182 = vector.load %arg4[%c0_36, %c0_37] : memref<32x16xf32, #tpu.memory_space<vmem>>, vector<32x16xf32>
    %cst_38 = arith.constant dense<0.000000e+00> : vector<32x64xf32>
    %183 = tpu.matmul %182, %181, %cst_38 {dimension_numbers = #tpu.dot_dimension_numbers<[1], [0], [0], [1], [0, 0, 1, 1], [], []>} : vector<32x16xf32>, vector<16x64xf32>, vector<32x64xf32> -> vector<32x64xf32>
    %184 = tpu.iota {dimensions = array<i32: 1>} : vector<1x64xi32>
    %c32_i32_39 = arith.constant 32 : i32
    %185 = vector.broadcast %c32_i32_39 : i32 to vector<1x64xi32>
    %186 = arith.cmpi slt, %184, %185 : vector<1x64xi32>
    %187 = vector.extract_strided_slice %183 {offsets = [0, 0], sizes = [16, 64], strides = [1, 1]} : vector<32x64xf32> to vector<16x64xf32>
    %188 = vector.extract_strided_slice %183 {offsets = [16, 0], sizes = [16, 64], strides = [1, 1]} : vector<32x64xf32> to vector<16x64xf32>
    %189 = vector.shape_cast %186 : vector<1x64xi1> to vector<1x64xi1>
    %190 = vector.broadcast %189 : vector<1x64xi1> to vector<16x64xi1>
    %191 = arith.select %190, %187, %188 : vector<16x64xi1>, vector<16x64xf32>
    %c0_40 = arith.constant 0 : index
    %c0_41 = arith.constant 0 : index
    %192 = vector.load %arg5[%c0_40, %c0_41] : memref<64x8xf32, #tpu.memory_space<vmem>>, vector<64x8xf32>
    %cst_42 = arith.constant dense<0.000000e+00> : vector<16x8xf32>
    %193 = tpu.matmul %191, %192, %cst_42 {dimension_numbers = #tpu.dot_dimension_numbers<[1], [0], [0], [1], [0, 0, 1, 1], [], []>} : vector<16x64xf32>, vector<64x8xf32>, vector<16x8xf32> -> vector<16x8xf32>
    %c0_43 = arith.constant 0 : index
    %c0_44 = arith.constant 0 : index
    %194 = vector.load %arg6[%c0_43, %c0_44] : memref<1x8xf32, #tpu.memory_space<vmem>>, vector<1x8xf32>
    %195 = vector.broadcast %194 : vector<1x8xf32> to vector<16x8xf32>
    %196 = arith.addf %193, %195 : vector<16x8xf32>
    %c0_45 = arith.constant 0 : index
    %c0_46 = arith.constant 0 : index
    %197 = vector.load %arg7[%c0_45, %c0_46] : memref<16x8xf32, #tpu.memory_space<vmem>>, vector<16x8xf32>
    tpu.vector_store %arg7[%c0_45, %c0_46], %196 {strides = array<i32>} : memref<16x8xf32, #tpu.memory_space<vmem>>, vector<16x8xf32>,
    return
  }
}

</mosaic_0001>

<bundles_post_ra>
// kernel: bilstm_crf_forward.1
= control target key start
LH: loop header
LB: loop body
LE: loop exit
PB: predicated region body
PF: predicated region fallthrough
CT: control target
= control target key end

     0   :  { %v1674_v3 = vmov 0   ;;  %v1675_v18 = vmov 0.0   ;;  %v1676_v28 = vmov 1   ;;  %s2077_s0 = inlined_call_operand.vmem [shape: s32[16,2], index: 0, kind: input, shape index: {}]   ;;  %s2078_s1 = inlined_call_operand.vmem [shape: f32[64,256], index: 1, kind: input, shape index: {}]   ;;  %s2079_s2 = inlined_call_operand.vmem [shape: f32[64,256], index: 2, kind: input, shape index: {}]   ;;  %s2080_s3 = inlined_call_operand.vmem [shape: f32[1,256], index: 3, kind: input, shape index: {}]   ;;  %s2081_s4 = inlined_call_operand.vmem [shape: f32[32,16], index: 4, kind: input, shape index: {}]   ;;  %s2082_s5 = inlined_call_operand.vmem [shape: f32[64,8], index: 5, kind: input, shape index: {}]   ;;  %s2083_s6 = inlined_call_operand.vmem [shape: f32[1,8], index: 6, kind: input, shape index: {}]   ;;  %s2084_s7 = inlined_call_operand.hbm [shape: f32[16,8], index: 7, kind: output, shape index: {}]  }
   0x1   :  { %v27_v0 = vld [vmem:[%s2077_s0] sm:$0xff]  ;;  %v56_v1 = vld [vmem:[%s2078_s1 + $0x8] sm:$0xff]  ;;  %v58_v2 = vld [vmem:[%s2078_s1 + $0x18] sm:$0xff]  ;;  %1550 = vset.pattern.permute.xlu0 %v1674_v3  ;;  %1552 = vset.pattern.permute.xlu1 %v1674_v3 }
   0x2   :  { %v1379_v4 = vpack.c.bf16 %v58_v2, %v56_v1  ;;  %v55_v5 = vld [vmem:[%s2078_s1] sm:$0xff]  ;;  %v57_v6 = vld [vmem:[%s2078_s1 + $0x10] sm:$0xff]  ;;  %v168_v7 = vld [vmem:[%s2079_s2 + $0x8] sm:$0xff]  ;;  %32 = vperm.xlu0 %1550, %v27_v0   ;;  %v39_v12 = vadd.s32 32, %v27_v0  ;;  %154 = vmatprep.mubr.f32.mxu0 %v1675_v18 }
   0x3   :  { %v1381_v8 = vpack.c.bf16 %v57_v6, %v55_v5  ;;  %v170_v9 = vld [vmem:[%s2079_s2 + $0x18] sm:$0xff]  ;;  %v167_v10 = vld [vmem:[%s2079_s2] sm:$0xff]  ;;  %v169_v11 = vld [vmem:[%s2079_s2 + $0x10] sm:$0xff]  ;;  %250 = vmatprep.mubr.f32.mxu1 %v1675_v18 }
   0x4   :  { %1380 = vmatprep.subr.bf16.mxu0 %v1379_v4  ;;  %v1748_v13 = vpack.c.bf16 %v170_v9, %v168_v7  ;;  %v1750_v14 = vpack.c.bf16 %v169_v11, %v167_v10  ;;  %v60_v15 = vld [vmem:[%s2078_s1 + $0x28] sm:$0xff]  ;;  %v62_v16 = vld [vmem:[%s2078_s1 + $0x38] sm:$0xff]  ;;  %v59_v17 = vld [vmem:[%s2078_s1 + $0x20] sm:$0xff] }
   0x5   :  { %1382 = vmatpush1.bf16.msra.mxu0 %v1381_v8  ;;  %v1383_v19 = vpack.c.bf16 %v62_v16, %v60_v15  ;;  %v61_v20 = vld [vmem:[%s2078_s1 + $0x30] sm:$0xff]  ;;  %v172_v21 = vld [vmem:[%s2079_s2 + $0x28] sm:$0xff]  ;;  %v174_v22 = vld [vmem:[%s2079_s2 + $0x38] sm:$0xff] }
   0x6   :  { %1396 = vmatprep.subr.bf16.mxu1 %v1748_v13  ;;  %v1385_v23 = vpack.c.bf16 %v61_v20, %v59_v17  ;;  %v1773_v24 = vpack.c.bf16 %v174_v22, %v172_v21  ;;  %v171_v25 = vld [vmem:[%s2079_s2 + $0x20] sm:$0xff]  ;;  %v173_v26 = vld [vmem:[%s2079_s2 + $0x30] sm:$0xff]  ;;  %v64_v27 = vld [vmem:[%s2078_s1 + $0x48] sm:$0xff]  ;;  %1551 = vset.pattern.permute.xlu0 %v1676_v28 }
   0x7   :  { %1398 = vmatpush1.bf16.msra.mxu1 %v1750_v14  ;;  %v1786_v29 = vpack.c.bf16 %v173_v26, %v171_v25  ;;  %v66_v30 = vld [vmem:[%s2078_s1 + $0x58] sm:$0xff]  ;;  %v63_v31 = vld [vmem:[%s2078_s1 + $0x40] sm:$0xff]  ;;  %v65_v32 = vld [vmem:[%s2078_s1 + $0x50] sm:$0xff]  ;;  %42 = vperm.xlu0 %1551, %v39_v12  }
   0x8   :  { %1384 = vmatprep.subr.bf16.mxu0 %v1383_v19  ;;  %v1387_v33 = vpack.c.bf16 %v66_v30, %v64_v27  ;;  %v176_v34 = vld [vmem:[%s2079_s2 + $0x48] sm:$0xff]  ;;  %v178_v35 = vld [vmem:[%s2079_s2 + $0x58] sm:$0xff]  ;;  %v175_v36 = vld [vmem:[%s2079_s2 + $0x40] sm:$0xff]  ;;  %1400 = vmatprep.subr.bf16.mxu1 %v1773_v24  ;;  %v1389_v37 = vpack.c.bf16 %v65_v32, %v63_v31 }
   0x9   :  { %1386 = vmatpush1.bf16.msra.mxu0 %v1385_v23  ;;  %v1807_v38 = vpack.c.bf16 %v178_v35, %v176_v34  ;;  %v177_v39 = vld [vmem:[%s2079_s2 + $0x50] sm:$0xff]  ;;  %v68_v40 = vld [vmem:[%s2078_s1 + $0x68] sm:$0xff]  ;;  %v70_v41 = vld [vmem:[%s2078_s1 + $0x78] sm:$0xff] }
   0xa   :  { %1388 = vmatprep.subr.bf16.mxu0 %v1387_v33  ;;  %v1391_v42 = vpack.c.bf16 %v70_v41, %v68_v40  ;;  %v67_v43 = vld [vmem:[%s2078_s1 + $0x60] sm:$0xff]  ;;  %v69_v44 = vld [vmem:[%s2078_s1 + $0x70] sm:$0xff]  ;;  %v180_v45 = vld [vmem:[%s2079_s2 + $0x68] sm:$0xff]  ;;  %v1828_v46 = vpack.c.bf16 %v177_v39, %v175_v36 }
   0xb   :  { %1402 = vmatpush1.bf16.msra.mxu1 %v1786_v29  ;;  %v182_v47 = vld [vmem:[%s2079_s2 + $0x78] sm:$0xff]  ;;  %v179_v49 = vld [vmem:[%s2079_s2 + $0x60] sm:$0xff]  ;;  %v181_v50 = vld [vmem:[%s2079_s2 + $0x70] sm:$0xff] }
   0xc   :  { %1404 = vmatprep.subr.bf16.mxu1 %v1807_v38  ;;  %v1834_v48 = vpack.c.bf16 %v182_v47, %v180_v45 }
   0xd   :  { %12 = vsyncpa [#allocation4], 0  ;;  %1390 = vmatpush1.bf16.msra.mxu0 %v1389_v37  ;;  %v1393_v51 = vpack.c.bf16 %v69_v44, %v67_v43  ;;  %v1843_v52 = vpack.c.bf16 %v181_v50, %v179_v49  ;;  %v29_v53 = vlaneseq  ;;  %vm83_vm2 = vcmask 523264   ;;  %v71_v62 = vld [vmem:[%s2080_s3] sm:$0x3]  ;;  %s1677_s3 = smov 64  }
   0xe   :  { %1392 = vmatprep.subr.bf16.mxu0 %v1391_v42  ;;  %v28_v16 = vld [vmem:[%s2077_s0 + $0x8] sm:$0xff]  ;;  %vm285_vm7 = vcmask 517120   ;;  %vm397_vm8 = vcmask 519170   ;;  %vm627_vm9 = vcmask 523270   ;;  %vm512_vm10 = vcmask 521220  }
   0xf   :  { %1406 = vmatpush1.bf16.msra.mxu1 %v1828_v46  ;;  %v1859_v55 = vand.u32 127, %v29_v53  ;;  %v74_v60 = vshrl.u32 %v29_v53, 7  ;;  %v40_v17 = vadd.s32 32, %v28_v16  ;;  %vm1082_vm11 = vcmask 130048  }
  0x10   :  { %1408 = vmatprep.subr.bf16.mxu1 %v1834_v48  ;;  %vm1281_vm13 = vcmask 64512  }
  0x11   :  { %1394 = vmatpush1.bf16.msra.mxu0 %v1393_v51  ;;  %v75_v61 = vsub.s32 0, %v74_v60  ;;  %v79_v3 = vsub.s32 1, %v74_v60  ;;  %vm1180_vm12 = vcmp.lt.s32.totalorder %v1859_v55, 32 }
  0x12   :  { %1412 = vmatprep.subr.bf16.mxu0 %v1748_v13 }
  0x13   :  { %1410 = vmatpush1.bf16.msra.mxu1 %v1843_v52  ;;  %v1877_v63 = vrot.slane %v71_v62, %v75_v61  ;;  %v1883_v6 = vrot.slane %v71_v62, %v79_v3 }
  0x14   :  { %1428 = vmatprep.subr.bf16.mxu1 %v1748_v13 }
  0x16   :  { %251 = vmatmul.mubr.f32.vlgmr.msra.gmra.mrb[0].mxu1 %v1675_v18 }
  0x17   :  { %1430 = vmatpush1.bf16.msra.mxu1 %v1750_v14  ;;  %468 = vmatprep.mubr.f32.mxu1 %v1675_v18 }
  0x18   :  { %1432 = vmatprep.subr.bf16.mxu1 %v1773_v24 }
  0x1b   :  { %1434 = vmatpush1.bf16.msra.mxu1 %v1786_v29 }
  0x1c   :  { %1436 = vmatprep.subr.bf16.mxu1 %v1807_v38 }
  0x1f   :  { %1438 = vmatpush1.bf16.msra.mxu1 %v1828_v46 }
  0x20   :  { %1440 = vmatprep.subr.bf16.mxu1 %v1834_v48 }
  0x23   :  { %1442 = vmatpush1.bf16.msra.mxu1 %v1843_v52 }
  0x24   :  { %1460 = vmatprep.subr.bf16.mxu1 %v1748_v13 }
  0x81   :  { %v33_v54 = vpop.permute.xlu0 %32 }
  0x82   :  { %vm37_vm0 = vcmp.eq.s32.totalorder %v1859_v55, %v33_v54 }
  0x86   :  { %v43_v56 = vpop.permute.xlu0 %42 }
  0x87   :  { %vm47_vm1 = vcmp.eq.s32.totalorder %v1859_v55, %v43_v56 }
  0x88   :  { %vm49_vm3 = vmor %vm37_vm0, %vm47_vm1 }
  0x89   :  { %v1300_v57 = vsel %vm49_vm3, 1.0, %v1675_v18 }
  0x8a   :  { %1302 = vmatmul.mubr.msk.f32.vlgmr.msra.gmra.mrb[0].mxu0 %vm83_vm2, %v1300_v57 }
  0x8b   :  { %1414 = vmatpush1.bf16.msra.mxu0 %v1750_v14  ;;  %160 = vmatprep.mubr.f32.mxu0 %v1675_v18 }
  0x8c   :  { %1416 = vmatprep.subr.bf16.mxu0 %v1773_v24 }
  0x8f   :  { %1418 = vmatpush1.bf16.msra.mxu0 %v1786_v29 }
  0x90   :  { %1420 = vmatprep.subr.bf16.mxu0 %v1807_v38 }
  0x93   :  { %1422 = vmatpush1.bf16.msra.mxu0 %v1828_v46 }
  0x94   :  { %1424 = vmatprep.subr.bf16.mxu0 %v1834_v48 }
  0x97   :  { %1426 = vmatpush1.bf16.msra.mxu0 %v1843_v52 }
  0x98   :  { %1444 = vmatprep.subr.bf16.mxu0 %v1748_v13 }
  0xe9   :  { %v252_v58 = vpop.f32.mrb[0].mxu1 }
  0xea   :  { %v254_v59 = vpop.f32.mrb[1].mxu1 }
 0x15d   :  { %v156_v0 = vpop.f32.mrb[0].mxu0 }
 0x15e   :  { %v1880_v1 = vadd.f32 %v156_v0, %v1877_v63  ;;  %v158_v2 = vpop.f32.mrb[1].mxu0 }
 0x15f   :  { %v1886_v7 = vadd.f32 %v158_v2, %v1883_v6 }
 0x160   :  { %v257_v4 = vadd.f32 %v252_v58, %v1880_v1 }
 0x161   :  { %v258_v8 = vadd.f32 %v254_v59, %v1886_v7 }
 0x162   :  { %v1304_v5 = vmul.f32 -1.442695, %v257_v4 }
 0x163   :  { %v1305_v19 = vmul.f32 -1.442695, %v258_v8 }
 0x164   :  { %1554 = vpow2.f32 %v1304_v5 }
 0x165   :  { %1556 = vtanh.f32 %v258_v8 }
 0x16e   :  { %v1555_v9 = vpop.eup %1554 }
 0x16f   :  { %v265_v10 = vadd.f32 1.0, %v1555_v9  ;;  %v1557_v11 = vpop.eup %1556 }
 0x171   :  { %1558 = vrcp.f32 %v265_v10 }
 0x172   :  { %1560 = vpow2.f32 %v1305_v19 }
 0x17b   :  { %v1559_v12 = vpop.eup %1558 }
 0x17c   :  { %v273_v15 = vmul.f32 %v1559_v12, %v1557_v11  ;;  %v1561_v20 = vpop.eup %1560  ;;  %v272_v22 = vmul.f32 0.0, %v1559_v12 }
 0x17d   :  { %v266_v21 = vadd.f32 1.0, %v1561_v20 }
 0x17e   :  { %275 = vrot.lane.b32.xlu1 %v273_v15, %s1677_s3 }
 0x17f   :  { %1562 = vrcp.f32 %v266_v21 }
 0x182   :  { %35 = vperm.xlu1 %1552, %v28_v16  }
 0x186   :  { %1553 = vset.pattern.permute.xlu1 %v1676_v28 }
 0x187   :  { %45 = vperm.xlu1 %1553, %v40_v17  }
 0x189   :  { %v1563_v26 = vpop.eup %1562 }
 0x1f0   :  { %v276_v23 = vpop.permute.xlu1 %275 }
 0x1f1   :  { %v278_v25 = vadd.f32 %v276_v23, %v272_v22 }
 0x1f3   :  { %1564 = vtanh.f32 %v278_v25  ;;  %v382_v49 = vrot.slane %v278_v25, 6 }
 0x1fd   :  { %v1565_v27 = vpop.eup %1564 }
 0x1fe   :  { %v280_v30 = vmul.f32 %v1565_v27, %v1563_v26 }
 0x200   :  { %282 = vrot.lane.b32.xlu0 %v280_v30, %s1677_s3 }
 0x201   :  { %v36_v31 = vpop.permute.xlu1 %35 }
 0x202   :  { %vm38_vm4 = vcmp.eq.s32.totalorder %v1859_v55, %v36_v31 }
 0x206   :  { %v46_v32 = vpop.permute.xlu1 %45 }
 0x207   :  { %vm48_vm5 = vcmp.eq.s32.totalorder %v1859_v55, %v46_v32 }
 0x208   :  { %vm50_vm6 = vmor %vm38_vm4, %vm48_vm5 }
 0x209   :  { %v1301_v28 = vsel %vm50_vm6, 1.0, %v1675_v18 }
 0x20a   :  { %1303 = vmatmul.mubr.msk.f32.gmra.mrb[2].mxu0 %vm83_vm2, %v1301_v28 }
 0x20b   :  { %353 = vmatprep.mubr.f32.mxu0 %v1675_v18 }
 0x272   :  { %v283_v33 = vpop.permute.xlu0 %282 }
 0x273   :  { %286 = vst.msk [vmem:[#allocation2] sm:$0x3] %vm285_vm7, %v283_v33  ;;  %1306 = vmatmul.mubr.msk.f32.vlgmr.msra.gmra.mrb[4].mxu0 %vm83_vm2, %v283_v33 }
 0x274   :  { %1446 = vmatpush1.bf16.msra.mxu0 %v1750_v14  ;;  %583 = vmatprep.mubr.f32.mxu0 %v1675_v18 }
 0x275   :  { %1448 = vmatprep.subr.bf16.mxu0 %v1773_v24 }
 0x278   :  { %1450 = vmatpush1.bf16.msra.mxu0 %v1786_v29 }
 0x279   :  { %1452 = vmatprep.subr.bf16.mxu0 %v1807_v38 }
 0x27c   :  { %1454 = vmatpush1.bf16.msra.mxu0 %v1828_v46 }
 0x27d   :  { %1456 = vmatprep.subr.bf16.mxu0 %v1834_v48 }
 0x280   :  { %1458 = vmatpush1.bf16.msra.mxu0 %v1843_v52 }
 0x281   :  { %1476 = vmatprep.subr.bf16.mxu0 %v1748_v13 }
 0x2dd   :  { %v1911_v34 = vpop.f32.mrb[2].mxu0 }
 0x2de   :  { %v1913_v35 = vpop.f32.mrb[3].mxu0 }
 0x346   :  { %v355_v36 = vpop.f32.mrb[4].mxu0 }
 0x347   :  { %v362_v37 = vrot.slane %v355_v36, 6  ;;  %v357_v39 = vpop.f32.mrb[5].mxu0 }
 0x348   :  { %v363_v42 = vrot.slane %v357_v39, 6 }
 0x349   :  { %v366_v40 = vadd.f32 %v362_v37, %v1880_v1 }
 0x34a   :  { %v367_v43 = vadd.f32 %v363_v42, %v1886_v7 }
 0x34b   :  { %v1307_v41 = vmul.f32 -1.442695, %v366_v40 }
 0x34c   :  { %v1308_v54 = vmul.f32 -1.442695, %v367_v43 }
 0x34d   :  { %1566 = vpow2.f32 %v1307_v41 }
 0x34e   :  { %1568 = vtanh.f32 %v367_v43 }
 0x357   :  { %v1567_v44 = vpop.eup %1566 }
 0x358   :  { %v374_v45 = vadd.f32 1.0, %v1567_v44  ;;  %v1569_v47 = vpop.eup %1568 }
 0x35a   :  { %1570 = vrcp.f32 %v374_v45 }
 0x35b   :  { %1572 = vpow2.f32 %v1308_v54 }
 0x364   :  { %v1571_v50 = vpop.eup %1570 }
 0x365   :  { %v385_v51 = vmul.f32 %v1571_v50, %v1569_v47  ;;  %v384_v53 = vmul.f32 %v1571_v50, %v382_v49  ;;  %v1573_v56 = vpop.eup %1572 }
 0x366   :  { %v375_v57 = vadd.f32 1.0, %v1573_v56 }
 0x367   :  { %387 = vrot.lane.b32.xlu1 %v385_v51, %s1677_s3 }
 0x368   :  { %1574 = vrcp.f32 %v375_v57 }
 0x372   :  { %v1575_v60 = vpop.eup %1574 }
 0x3d9   :  { %v388_v58 = vpop.permute.xlu1 %387 }
 0x3da   :  { %v390_v59 = vadd.f32 %v388_v58, %v384_v53 }
 0x3dc   :  { %1576 = vtanh.f32 %v390_v59  ;;  %v497_v17 = vrot.slane %v390_v59, 6 }
 0x3e6   :  { %v1577_v61 = vpop.eup %1576 }
 0x3e7   :  { %v1918_v62 = vmul.f32 %v1577_v61, %v1575_v60 }
 0x3e9   :  { %v399_v0 = vrot.slane %v1918_v62, 2 }
 0x3eb   :  { %400 = vrot.lane.b32.xlu0 %v399_v0, %s1677_s3  ;;  %v1967_v0 = vadd.f32 %v1911_v34, %v1877_v63 }
 0x45d   :  { %v401_v2 = vpop.permute.xlu0 %400 }
 0x45e   :  { %1309 = vmatmul.mubr.msk.f32.vlgmr.msra.gmra.mrb[2].mxu1 %vm83_vm2, %v401_v2 }
 0x45f   :  { %1462 = vmatpush1.bf16.msra.mxu1 %v1750_v14  ;;  %698 = vmatprep.mubr.f32.mxu1 %v1675_v18 }
 0x460   :  { %1464 = vmatprep.subr.bf16.mxu1 %v1773_v24 }
 0x463   :  { %1466 = vmatpush1.bf16.msra.mxu1 %v1786_v29 }
 0x464   :  { %1468 = vmatprep.subr.bf16.mxu1 %v1807_v38 }
 0x467   :  { %1470 = vmatpush1.bf16.msra.mxu1 %v1828_v46 }
 0x468   :  { %1472 = vmatprep.subr.bf16.mxu1 %v1834_v48 }
 0x46b   :  { %1474 = vmatpush1.bf16.msra.mxu1 %v1843_v52 }
 0x46c   :  { %1492 = vmatprep.subr.bf16.mxu1 %v1748_v13 }
 0x531   :  { %v470_v3 = vpop.f32.mrb[2].mxu1 }
 0x532   :  { %v477_v4 = vrot.slane %v470_v3, 4  ;;  %v472_v5 = vpop.f32.mrb[3].mxu1 }
 0x533   :  { %v478_v10 = vrot.slane %v472_v5, 4 }
 0x534   :  { %v481_v8 = vadd.f32 %v477_v4, %v1880_v1 }
 0x535   :  { %v482_v11 = vadd.f32 %v478_v10, %v1886_v7 }
 0x536   :  { %v1310_v9 = vmul.f32 -1.442695, %v481_v8  ;;  %v1972_v8 = vadd.f32 %v1913_v35, %v1883_v6 }
 0x537   :  { %v1311_v22 = vmul.f32 -1.442695, %v482_v11 }
 0x538   :  { %1578 = vpow2.f32 %v1310_v9 }
 0x539   :  { %1580 = vtanh.f32 %v482_v11 }
 0x542   :  { %v1579_v12 = vpop.eup %1578 }
 0x543   :  { %v489_v15 = vadd.f32 1.0, %v1579_v12  ;;  %v1581_v16 = vpop.eup %1580 }
 0x545   :  { %1582 = vrcp.f32 %v489_v15 }
 0x546   :  { %1584 = vpow2.f32 %v1311_v22 }
 0x54f   :  { %v1583_v19 = vpop.eup %1582 }
 0x550   :  { %v500_v20 = vmul.f32 %v1583_v19, %v1581_v16  ;;  %v499_v21 = vmul.f32 %v1583_v19, %v497_v17  ;;  %v1585_v23 = vpop.eup %1584 }
 0x551   :  { %v490_v25 = vadd.f32 1.0, %v1585_v23 }
 0x552   :  { %502 = vrot.lane.b32.xlu1 %v500_v20, %s1677_s3 }
 0x553   :  { %1586 = vrcp.f32 %v490_v25 }
 0x55d   :  { %v1587_v30 = vpop.eup %1586 }
 0x5c4   :  { %v503_v26 = vpop.permute.xlu1 %502 }
 0x5c5   :  { %v505_v27 = vadd.f32 %v503_v26, %v499_v21 }
 0x5c7   :  { %1588 = vtanh.f32 %v505_v27  ;;  %v612_v49 = vrot.slane %v505_v27, 6 }
 0x5d1   :  { %v1589_v31 = vpop.eup %1588 }
 0x5d2   :  { %v1935_v32 = vmul.f32 %v1589_v31, %v1587_v30 }
 0x5d4   :  { %v514_v28 = vrot.slane %v1935_v32, 4 }
 0x5d6   :  { %515 = vrot.lane.b32.xlu0 %v514_v28, %s1677_s3 }
 0x648   :  { %v516_v33 = vpop.permute.xlu0 %515 }
 0x649   :  { %1312 = vmatmul.mubr.msk.f32.vlgmr.msra.gmra.mrb[6].mxu0 %vm83_vm2, %v516_v33 }
 0x64a   :  { %1478 = vmatpush1.bf16.msra.mxu0 %v1750_v14  ;;  %803 = vmatprep.mubr.f32.mxu0 %v1675_v18 }
 0x64b   :  { %1480 = vmatprep.subr.bf16.mxu0 %v1773_v24 }
 0x64e   :  { %1482 = vmatpush1.bf16.msra.mxu0 %v1786_v29 }
 0x64f   :  { %1484 = vmatprep.subr.bf16.mxu0 %v1807_v38 }
 0x652   :  { %1486 = vmatpush1.bf16.msra.mxu0 %v1828_v46 }
 0x653   :  { %1488 = vmatprep.subr.bf16.mxu0 %v1834_v48 }
 0x656   :  { %1490 = vmatpush1.bf16.msra.mxu0 %v1843_v52 }
 0x657   :  { %1508 = vmatprep.subr.bf16.mxu0 %v1748_v13 }
 0x71c   :  { %v585_v36 = vpop.f32.mrb[6].mxu0 }
 0x71d   :  { %v592_v37 = vrot.slane %v585_v36, 2  ;;  %v587_v39 = vpop.f32.mrb[7].mxu0 }
 0x71e   :  { %v593_v42 = vrot.slane %v587_v39, 2 }
 0x71f   :  { %v596_v40 = vadd.f32 %v592_v37, %v1880_v1 }
 0x720   :  { %v597_v43 = vadd.f32 %v593_v42, %v1886_v7 }
 0x721   :  { %v1313_v41 = vmul.f32 -1.442695, %v596_v40 }
 0x722   :  { %v1314_v13 = vmul.f32 -1.442695, %v597_v43 }
 0x723   :  { %1590 = vpow2.f32 %v1313_v41 }
 0x724   :  { %1592 = vtanh.f32 %v597_v43 }
 0x72d   :  { %v1591_v44 = vpop.eup %1590 }
 0x72e   :  { %v604_v45 = vadd.f32 1.0, %v1591_v44  ;;  %v1593_v47 = vpop.eup %1592 }
 0x730   :  { %1594 = vrcp.f32 %v604_v45 }
 0x731   :  { %1596 = vpow2.f32 %v1314_v13 }
 0x73a   :  { %v1595_v50 = vpop.eup %1594 }
 0x73b   :  { %v615_v51 = vmul.f32 %v1595_v50, %v1593_v47  ;;  %v614_v53 = vmul.f32 %v1595_v50, %v612_v49  ;;  %v1597_v54 = vpop.eup %1596 }
 0x73c   :  { %v605_v1 = vadd.f32 1.0, %v1597_v54 }
 0x73d   :  { %617 = vrot.lane.b32.xlu1 %v615_v51, %s1677_s3 }
 0x73e   :  { %1598 = vrcp.f32 %v605_v1 }
 0x748   :  { %v1599_v7 = vpop.eup %1598 }
 0x7af   :  { %v618_v56 = vpop.permute.xlu1 %617 }
 0x7b0   :  { %v620_v57 = vadd.f32 %v618_v56, %v614_v53 }
 0x7b2   :  { %1600 = vtanh.f32 %v620_v57  ;;  %v721_v15 = vrot.slane %v620_v57, 6 }
 0x7bc   :  { %v1601_v58 = vpop.eup %1600 }
 0x7bd   :  { %v1952_v59 = vmul.f32 %v1601_v58, %v1599_v7 }
 0x7bf   :  { %v629_v60 = vrot.slane %v1952_v59, 6 }
 0x7c1   :  { %630 = vrot.lane.b32.xlu0 %v629_v60, %s1677_s3 }
 0x833   :  { %v631_v61 = vpop.permute.xlu0 %630 }
 0x834   :  { %1315 = vmatmul.mubr.msk.f32.vlgmr.msra.gmra.mrb[4].mxu1 %vm83_vm2, %v631_v61 }
 0x835   :  { %1494 = vmatpush1.bf16.msra.mxu1 %v1750_v14  ;;  %917 = vmatprep.mubr.f32.mxu1 %v1675_v18 }
 0x836   :  { %1496 = vmatprep.subr.bf16.mxu1 %v1773_v24 }
 0x839   :  { %1498 = vmatpush1.bf16.msra.mxu1 %v1786_v29 }
 0x83a   :  { %1500 = vmatprep.subr.bf16.mxu1 %v1807_v38 }
 0x83d   :  { %1502 = vmatpush1.bf16.msra.mxu1 %v1828_v46 }
 0x83e   :  { %1504 = vmatprep.subr.bf16.mxu1 %v1834_v48 }
 0x841   :  { %1506 = vmatpush1.bf16.msra.mxu1 %v1843_v52 }
 0x907   :  { %v700_v2 = vpop.f32.mrb[4].mxu1 }
 0x908   :  { %v705_v3 = vadd.f32 %v700_v2, %v1967_v0  ;;  %v702_v4 = vpop.f32.mrb[5].mxu1 }
 0x909   :  { %v706_v9 = vadd.f32 %v702_v4, %v1972_v8 }
 0x90a   :  { %v1316_v5 = vmul.f32 -1.442695, %v705_v3 }
 0x90b   :  { %v1317_v17 = vmul.f32 -1.442695, %v706_v9 }
 0x90c   :  { %1602 = vpow2.f32 %v1316_v5 }
 0x90d   :  { %1604 = vtanh.f32 %v706_v9 }
 0x916   :  { %v1603_v10 = vpop.eup %1602 }
 0x917   :  { %v713_v11 = vadd.f32 1.0, %v1603_v10  ;;  %v1605_v12 = vpop.eup %1604 }
 0x919   :  { %1606 = vrcp.f32 %v713_v11 }
 0x91a   :  { %1608 = vpow2.f32 %v1317_v17 }
 0x923   :  { %v1607_v63 = vpop.eup %1606 }
 0x924   :  { %v724_v34 = vmul.f32 %v1607_v63, %v1605_v12  ;;  %v723_v16 = vmul.f32 %v1607_v63, %v721_v15  ;;  %v1609_v19 = vpop.eup %1608 }
 0x925   :  { %v714_v20 = vadd.f32 1.0, %v1609_v19 }
 0x926   :  { %726 = vrot.lane.b32.xlu1 %v724_v34, %s1677_s3 }
 0x927   :  { %1610 = vrcp.f32 %v714_v20 }
 0x931   :  { %v1611_v35 = vpop.eup %1610 }
 0x998   :  { %v727_v21 = vpop.permute.xlu1 %726 }
 0x999   :  { %v729_v6 = vadd.f32 %v727_v21, %v723_v16 }
 0x99b   :  { %1612 = vtanh.f32 %v729_v6 }
 0x9a5   :  { %v1613_v22 = vpop.eup %1612 }
 0x9a6   :  { %v731_v23 = vmul.f32 %v1613_v22, %v1611_v35 }
 0x9a8   :  { %733 = vrot.lane.b32.xlu0 %v731_v23, %s1677_s3 }
 0xa1a   :  { %v734_v25 = vpop.permute.xlu0 %733 }
 0xa1b   :  { %736 = vst.msk [vmem:[#allocation2 + $0x8] sm:$0x3] %vm285_vm7, %v734_v25  ;;  %1318 = vmatmul.mubr.msk.f32.vlgmr.msra.gmra.mrb[8].mxu0 %vm83_vm2, %v734_v25 }
 0xa1c   :  { %1510 = vmatpush1.bf16.msra.mxu0 %v1750_v14  ;;  %1031 = vmatprep.mubr.f32.mxu0 %v1675_v18 }
 0xa1d   :  { %1512 = vmatprep.subr.bf16.mxu0 %v1773_v24 }
 0xa20   :  { %1514 = vmatpush1.bf16.msra.mxu0 %v1786_v29 }
 0xa21   :  { %1516 = vmatprep.subr.bf16.mxu0 %v1807_v38 }
 0xa24   :  { %1518 = vmatpush1.bf16.msra.mxu0 %v1828_v46  ;;  %v832_v46 = vrot.slane %v729_v6, 6 }
 0xa25   :  { %1520 = vmatprep.subr.bf16.mxu0 %v1834_v48 }
 0xa28   :  { %1522 = vmatpush1.bf16.msra.mxu0 %v1843_v52 }
 0xaee   :  { %v805_v26 = vpop.f32.mrb[8].mxu0 }
 0xaef   :  { %v812_v27 = vrot.slane %v805_v26, 6  ;;  %v807_v30 = vpop.f32.mrb[9].mxu0 }
 0xaf0   :  { %v813_v18 = vrot.slane %v807_v30, 6 }
 0xaf1   :  { %v816_v31 = vadd.f32 %v812_v27, %v1967_v0 }
 0xaf2   :  { %v817_v24 = vadd.f32 %v813_v18, %v1972_v8 }
 0xaf3   :  { %v1319_v14 = vmul.f32 -1.442695, %v816_v31 }
 0xaf4   :  { %v1320_v52 = vmul.f32 -1.442695, %v817_v24 }
 0xaf5   :  { %1614 = vpow2.f32 %v1319_v14 }
 0xaf6   :  { %1616 = vtanh.f32 %v817_v24 }
 0xaff   :  { %v1615_v28 = vpop.eup %1614 }
 0xb00   :  { %v824_v29 = vadd.f32 1.0, %v1615_v28  ;;  %v1617_v38 = vpop.eup %1616 }
 0xb02   :  { %1618 = vrcp.f32 %v824_v29 }
 0xb03   :  { %1620 = vpow2.f32 %v1320_v52  ;;  %v1185_v52 = vld [vmem:[%s2082_s5] sm:$0xff] }
 0xb0c   :  { %v1619_v33 = vpop.eup %1618 }
 0xb0d   :  { %v835_v48 = vmul.f32 %v1619_v33, %v1617_v38  ;;  %v834_v36 = vmul.f32 %v1619_v33, %v832_v46  ;;  %v1621_v37 = vpop.eup %1620 }
 0xb0e   :  { %v825_v39 = vadd.f32 1.0, %v1621_v37  ;;  %v1186_v37 = vld [vmem:[%s2082_s5 + $0x8] sm:$0xff] }
 0xb0f   :  { %837 = vrot.lane.b32.xlu1 %v835_v48, %s1677_s3  ;;  %v1078_v48 = vld [vmem:[%s2081_s4] sm:$0xff] }
 0xb10   :  { %1622 = vrcp.f32 %v825_v39 }
 0xb1a   :  { %v1623_v42 = vpop.eup %1622 }
 0xb81   :  { %v838_v40 = vpop.permute.xlu1 %837 }
 0xb82   :  { %v840_v41 = vadd.f32 %v838_v40, %v834_v36 }
 0xb84   :  { %1624 = vtanh.f32 %v840_v41  ;;  %v946_v58 = vrot.slane %v840_v41, 6 }
 0xb8e   :  { %v1625_v43 = vpop.eup %1624 }
 0xb8f   :  { %v1990_v44 = vmul.f32 %v1625_v43, %v1623_v42  ;;  %v1527_v42 = vpack.c.bf16 %v1186_v37, %v1185_v52  ;;  %v1187_v43 = vld [vmem:[%s2082_s5 + $0x10] sm:$0xff] }
 0xb91   :  { %v848_v45 = vrot.slane %v1990_v44, 2 }
 0xb93   :  { %849 = vrot.lane.b32.xlu0 %v848_v45, %s1677_s3  ;;  %v1079_v45 = vld [vmem:[%s2081_s4 + $0x8] sm:$0xff] }
 0xc05   :  { %v850_v47 = vpop.permute.xlu0 %849 }
 0xc06   :  { %1321 = vmatmul.mubr.msk.f32.vlgmr.msra.gmra.mrb[6].mxu1 %vm83_vm2, %v850_v47  ;;  %v1080_v47 = vld [vmem:[%s2081_s4 + $0x10] sm:$0xff] }
 0xc07   :  { %1354 = vmatprep.mubr.msk.f32.mxu1 %vm1082_vm11, %v1078_v48 }
 0xcd9   :  { %v919_v49 = vpop.f32.mrb[6].mxu1 }
 0xcda   :  { %v926_v50 = vrot.slane %v919_v49, 4  ;;  %v921_v51 = vpop.f32.mrb[7].mxu1 }
 0xcdb   :  { %v927_v54 = vrot.slane %v921_v51, 4  ;;  %v1189_v51 = vld [vmem:[%s2082_s5 + $0x20] sm:$0xff] }
 0xcdc   :  { %v930_v53 = vadd.f32 %v926_v50, %v1967_v0  ;;  %v1081_v50 = vld [vmem:[%s2081_s4 + $0x18] sm:$0xff] }
 0xcdd   :  { %v931_v1 = vadd.f32 %v927_v54, %v1972_v8  ;;  %v1191_v54 = vld [vmem:[%s2082_s5 + $0x30] sm:$0xff] }
 0xcde   :  { %v1322_v13 = vmul.f32 -1.442695, %v930_v53  ;;  %v1190_v53 = vld [vmem:[%s2082_s5 + $0x28] sm:$0xff] }
 0xcdf   :  { %v1323_v3 = vmul.f32 -1.442695, %v931_v1 }
 0xce0   :  { %1626 = vpow2.f32 %v1322_v13  ;;  %v1535_v13 = vpack.c.bf16 %v1190_v53, %v1189_v51 }
 0xce1   :  { %1628 = vtanh.f32 %v931_v1  ;;  %v1192_v1 = vld [vmem:[%s2082_s5 + $0x38] sm:$0xff] }
 0xcea   :  { %v1627_v56 = vpop.eup %1626 }
 0xceb   :  { %v938_v57 = vadd.f32 1.0, %v1627_v56  ;;  %v1629_v7 = vpop.eup %1628  ;;  %v1539_v56 = vpack.c.bf16 %v1192_v1, %v1191_v54 }
 0xced   :  { %1630 = vrcp.f32 %v938_v57 }
 0xcee   :  { %1632 = vpow2.f32 %v1323_v3  ;;  %v1331_v3 = vld [vmem:[%s2083_s6] ss:$0 sm:$0xff] }
 0xcf7   :  { %v1631_v60 = vpop.eup %1630 }
 0xcf8   :  { %v949_v61 = vmul.f32 %v1631_v60, %v1629_v7  ;;  %v948_v2 = vmul.f32 %v1631_v60, %v946_v58  ;;  %v1633_v4 = vpop.eup %1632 }
 0xcf9   :  { %v939_v5 = vadd.f32 1.0, %v1633_v4 }
 0xcfa   :  { %951 = vrot.lane.b32.xlu1 %v949_v61, %s1677_s3 }
 0xcfb   :  { %1634 = vrcp.f32 %v939_v5 }
 0xd05   :  { %v1635_v11 = vpop.eup %1634 }
 0xd6c   :  { %v952_v9 = vpop.permute.xlu1 %951 }
 0xd6d   :  { %v954_v10 = vadd.f32 %v952_v9, %v948_v2 }
 0xd6f   :  { %1636 = vtanh.f32 %v954_v10  ;;  %v1060_v27 = vrot.slane %v954_v10, 6 }
 0xd79   :  { %v1637_v12 = vpop.eup %1636 }
 0xd7a   :  { %v956_v15 = vmul.f32 %v1637_v12, %v1635_v11 }
 0xd7c   :  { %v962_v63 = vrot.slane %v956_v15, 4 }
 0xd7e   :  { %963 = vrot.lane.b32.xlu0 %v962_v63, %s1677_s3 }
 0xd82   :  { %394 = vrot.lane.b32.xlu0 %v1918_v62, %s1677_s3 }
 0xd86   :  { %624 = vrot.lane.b32.xlu0 %v1952_v59, %s1677_s3 }
 0xd8a   :  { %958 = vrot.lane.b32.xlu0 %v956_v15, %s1677_s3 }
 0xdf0   :  { %v964_v34 = vpop.permute.xlu0 %963 }
 0xdf1   :  { %1324 = vmatmul.mubr.msk.f32.vlgmr.msra.gmra.mrb[10].mxu0 %vm83_vm2, %v964_v34 }
 0xdf4   :  { %v395_v16 = vpop.permute.xlu0 %394 }
 0xdf5   :  { %398 = vst.msk [vmem:[#allocation2] sm:$0xc] %vm397_vm8, %v395_v16 }
 0xdf8   :  { %v625_v17 = vpop.permute.xlu0 %624 }
 0xdf9   :  { %628 = vst.msk [vmem:[#allocation2] sm:$0xc0] %vm627_vm9, %v625_v17 }
 0xdfc   :  { %v959_v19 = vpop.permute.xlu0 %958 }
 0xdfd   :  { %961 = vst.msk [vmem:[#allocation2 + $0x8] sm:$0x30] %vm512_vm10, %v959_v19 }
 0xec4   :  { %v1033_v62 = vpop.f32.mrb[10].mxu0 }
 0xec5   :  { %v1040_v20 = vrot.slane %v1033_v62, 2  ;;  %v1035_v59 = vpop.f32.mrb[11].mxu0 }
 0xec6   :  { %v1041_v35 = vrot.slane %v1035_v59, 2 }
 0xec7   :  { %v1044_v21 = vadd.f32 %v1040_v20, %v1967_v0 }
 0xec8   :  { %v1045_v22 = vadd.f32 %v1041_v35, %v1972_v8 }
 0xec9   :  { %v1325_v6 = vmul.f32 -1.442695, %v1044_v21 }
 0xeca   :  { %v1326_v0 = vmul.f32 -1.442695, %v1045_v22 }
 0xecb   :  { %1638 = vpow2.f32 %v1325_v6 }
 0xecc   :  { %1640 = vtanh.f32 %v1045_v22 }
 0xed5   :  { %v1639_v23 = vpop.eup %1638 }
 0xed6   :  { %v1052_v25 = vadd.f32 1.0, %v1639_v23  ;;  %v1641_v26 = vpop.eup %1640 }
 0xed8   :  { %1642 = vrcp.f32 %v1052_v25 }
 0xed9   :  { %1644 = vpow2.f32 %v1326_v0 }
 0xee2   :  { %v1643_v30 = vpop.eup %1642 }
 0xee3   :  { %v1063_v31 = vmul.f32 %v1643_v30, %v1641_v26  ;;  %v1062_v14 = vmul.f32 %v1643_v30, %v1060_v27  ;;  %v1645_v8 = vpop.eup %1644 }
 0xee4   :  { %v1053_v18 = vadd.f32 1.0, %v1645_v8 }
 0xee5   :  { %1065 = vrot.lane.b32.xlu1 %v1063_v31, %s1677_s3 }
 0xee6   :  { %1646 = vrcp.f32 %v1053_v18 }
 0xee9   :  { %509 = vrot.lane.b32.xlu1 %v1935_v32, %s1677_s3 }
 0xeed   :  { %844 = vrot.lane.b32.xlu1 %v1990_v44, %s1677_s3  ;;  %v1188_v44 = vld [vmem:[%s2082_s5 + $0x18] sm:$0xff]  ;;  %s1678_s5 = smov [#allocation3]  }
 0xeee   :  { %v1531_v49 = vpack.c.bf16 %v1188_v44, %v1187_v43  ;;  %s1289_s21 = sshll.u32 %s1678_s5, 4  ;;  %s1290_s21 = int_to_ptr.vmem [resolvable:$true] %s1289_s21 }
 0xeef   :  { %s1650_s22 = scalar_lea.vmem %s1290_s21, 256  ;;  %p1655_p1 = scmp.lt.s32.totalorder %s1290_s21, %s1290_s21 }
 0xef0   :  { %v1647_v46 = vpop.eup %1646  ;;  %p1651_p0 = scmp.ne.s32.totalorder %s1290_s21, %s1650_s22  ;;  %p1656_p2 = scmp.lt.s32.totalorder %s1650_s22, %s1650_s22 }
 0xef2   :  { %p1657_p3 = por %p1656_p2, %p1655_p1 }
 0xef4   :  { %p1658_p4 = pnand %p1657_p3, %p1651_p0 }
 0xf57   :  { %v1066_v24 = vpop.permute.xlu1 %1065 }
 0xf58   :  { %v1068_v28 = vadd.f32 %v1066_v24, %v1062_v14 }
 0xf5a   :  { %1648 = vtanh.f32 %v1068_v28 }
 0xf5b   :  { %v510_v29 = vpop.permute.xlu1 %509 }
 0xf5c   :  { %513 = vst.msk [vmem:[#allocation2] sm:$0x30] %vm512_vm10, %v510_v29 }
 0xf5f   :  { %v845_v38 = vpop.permute.xlu1 %844 }
 0xf60   :  { %847 = vst.msk [vmem:[#allocation2 + $0x8] sm:$0xc] %vm397_vm8, %v845_v38 }
 0xf63   :  { %v1076_v39 = vld [vmem:[#allocation2] sm:$0xff] }
 0xf64   :  { %v1649_v33 = vpop.eup %1648 }
 0xf65   :  { %v1070_v32 = vmul.f32 %v1649_v33, %v1647_v46 }
 0xf67   :  { %1072 = vrot.lane.b32.xlu1 %v1070_v32, %s1677_s3 }
 0xfd9   :  { %v1073_v36 = vpop.permute.xlu1 %1072 }
 0xfda   :  { %1075 = vst.msk [vmem:[#allocation2 + $0x8] sm:$0xc0] %vm627_vm9, %v1073_v36 }
 0xfe1   :  { %v1077_v40 = vld [vmem:[#allocation2 + $0x8] sm:$0xff] }
 0xfe2   :  { %v1523_v41 = vpack.c.bf16 %v1077_v40, %v1076_v39 }
 0xfe4   :  { %1524 = vmatprep.subr.bf16.mxu1 %v1523_v41 }
 0xfe5   :  { %1526 = vmatpush3.bf16.msra.mxu1 %v1523_v41 }
 0xfe6   :  { %1528 = vmatprep.subr.bf16.mxu1 %v1527_v42 }
 0xfe8   :  { %1355 = vmatmul.mubr.msk.f32.vlgmr.msra.gmra.mrb[8].mxu1 %vm1082_vm11, %v1079_v45 }
 0xfe9   :  { %1357 = vmatprep.mubr.msk.f32.mxu1 %vm1082_vm11, %v1080_v47  ;;  %1530 = vmatpush3.bf16.msra.mxu1 %v1527_v42 }
 0xfea   :  { %1532 = vmatprep.subr.bf16.mxu1 %v1531_v49 }
 0xfec   :  { %1358 = vmatmul.mubr.msk.f32.gmra.mrb[10].mxu1 %vm1082_vm11, %v1081_v50 }
 0xfed   :  { %1534 = vmatpush3.bf16.msra.mxu1 %v1531_v49 }
 0xfee   :  { %1536 = vmatprep.subr.bf16.mxu1 %v1535_v13 }
 0xff1   :  { %1538 = vmatpush3.bf16.msra.mxu1 %v1535_v13 }
 0xff2   :  { %1540 = vmatprep.subr.bf16.mxu1 %v1539_v56 }
 0xff5   :  { %1542 = vmatpush3.bf16.msra.mxu1 %v1539_v56 }
0x10bb   :  { %v1356_v57 = vpop.f32.mrb[8].mxu1 }
0x10bc   :  { %v1161_v7 = vpop.f32.mrb[9].mxu1 }
0x10bf   :  { %v1359_v58 = vpop.f32.mrb[10].mxu1 }
0x10c0   :  { %v1184_v60 = vsel %vm1180_vm12, %v1356_v57, %v1359_v58  ;;  %v1171_v61 = vpop.f32.mrb[11].mxu1 }
0x10c1   :  { %v1183_v2 = vsel %vm1180_vm12, %v1161_v7, %v1171_v61 }
0x10c2   :  { %1376 = vmatprep.mubr.msk.f32.mxu1 %vm83_vm2, %v1183_v2 }
0x10c3   :  { %1377 = vmatmul.mubr.msk.f32.vlgmr.msra.gmra.mrb[12].mxu1 %vm83_vm2, %v1184_v60 }
0x1196   :  { %v1378_v4 = vpop.f32.mrb[12].mxu1 }
0x1197   :  { %v1278_v5 = vadd.f32 %v1378_v4, %v1331_v3  ;;  %v1272_v9 = vpop.f32.mrb[13].mxu1 }
0x1198   :  { %v1273_v55 = vadd.f32 %v1331_v3, %v1272_v9 }
0x1199   :  { %1283 = vst.msk [vmem:[#allocation3 + $0x8] sm:$0xff] %vm1281_vm13, %v1278_v5 }
0x119a   :  { %1282 = vst.msk [vmem:[#allocation3] sm:$0xff] %vm1281_vm13, %v1273_v55 }
0x119b   :  { %1661 = shalt.err (!%p1658_p4)
}
0x119c   :  { %s1662_s6 = scalar_lea.hbm %s2084_s7, 256 }
0x119d   :  { %p1663_p5 = scmp.ne.s32.totalorder %s2084_s7, %s1662_s6  ;;  %p1666_p6 = scmp.lt.u32.totalorder %s1662_s6, %s2084_s7 }
0x119f   :  { %p1668_p7 = pnand %p1666_p6, %p1663_p5 }
0x11a1   :  { %1671 = shalt.err (!%p1668_p7)
}
0x11a2   :  { %s1679_s28 = smov 128   ;;  %s1680_s29 = smov 8  }
0x11a3   :  { %1295 = dma.vmem_to_hbm [thread:$0]  %s1290_s21, 256, %s2084_s7, [#allocation4], %s1679_s28, %s1679_s28, %s1680_s29  }
0x11a4   :  { %1672 = dma.done.wait [#allocation4], 256  }
0x11a5   :  { %1673 = vsyncadd [#allocation4], 4294967040 }
0x11a6   :  { %1299 = vsyncpa [#allocation4], 1 }

</bundles_post_ra>
